<compile_context>
chip_gen: v7x
topology: tpu7x:2x2x1
jax: 0.10.0
libtpu: 0.0.40
codegen_flags: <defaults>
</compile_context>

<pallas_src>
import jax
import jax.numpy as jnp
from jax.experimental import pallas as pl
from jax.experimental.pallas import tpu as pltpu

IN_FEATURES = 768
NUM_CLASSES = 6
PAD_N = 128        # lane-dense class width used for the MXU matmul in VMEM
OUT_PAD = 8        # narrow HBM-visible output width (>= NUM_CLASSES)
NEG_BIG = -1e30    # finite "-inf" for padded class columns (exp underflows to 0)


def emo_classifier_kernel(x_ref, w_ref, b_ref, logits_ref, probs_ref):
    # (TB, 768) @ (768, 128) on the MXU with f32 accumulation; the bias
    # broadcasts over rows and already carries NEG_BIG in padded class columns.
    logits = (
        jnp.dot(x_ref[...], w_ref[...], preferred_element_type=jnp.float32)
        + b_ref[...]
    )  # (TB, PAD_N)

    # Only the first OUT_PAD lanes go back to HBM (kernel is HBM-bound).
    logits_ref[...] = logits[:, :OUT_PAD].astype(logits_ref.dtype)

    # Numerically stable softmax over the class axis; padded columns hold
    # -1e30 so exp(-1e30 - m) == 0 and they never enter the denominator.
    m = jnp.max(logits, axis=-1, keepdims=True)
    e = jnp.exp(logits - m)
    denom = jnp.sum(e, axis=-1, keepdims=True)
    probs = e / denom  # exact divide; memory-bound kernel -> zero wall-clock cost
    probs_ref[...] = probs[:, :OUT_PAD].astype(probs_ref.dtype)


def _round_up(n, m):
    return ((n + m - 1) // m) * m


def _default_tb_max():
    # TB=2048 halves the ~0.35us/step pipeline-overhead share on v6e/v7x and
    # still fits their scoped-VMEM defaults; unknown chips / v5e stay at 1024
    # (v5e's scoped-VMEM default is only 16 MiB).
    try:
        kind = jax.devices()[0].device_kind.lower()
    except Exception:
        return 1024
    return 2048 if ("v6" in kind or "v7" in kind) else 1024


def prepare_params(w, b):
    """Pad (768, 6) weight / (6,) bias once to the 128-wide matmul layout.

    Padded bias columns hold NEG_BIG so padded logits columns vanish in the
    softmax (the class mask lives in the bias, not in the kernel).
    """
    w_pad = jnp.pad(w.astype(jnp.float32), ((0, 0), (0, PAD_N - NUM_CLASSES)))
    b_pad = jnp.full((1, PAD_N), NEG_BIG, dtype=jnp.float32)
    b_pad = b_pad.at[0, :NUM_CLASSES].set(b.astype(jnp.float32))
    return w_pad, b_pad


def emo_classifier(x, w_pad, b_pad, *, tb_max=None):
    """x: (B, 768) f32; w_pad/b_pad from prepare_params -> (logits (B,6), probs (B,6))."""
    if tb_max is None:
        tb_max = _default_tb_max()
    B = x.shape[0]
    # >= 2 grid steps whenever B > 8 so v7x can shard the parallel batch axis
    # across both TensorCores; row tile is a multiple of 8 (f32 sublanes).
    TB = min(tb_max, _round_up(pl.cdiv(B, 2), 8))
    grid = (pl.cdiv(B, TB),)

    cost = pl.CostEstimate(
        flops=2 * B * IN_FEATURES * PAD_N,
        transcendentals=B * PAD_N,
        bytes_accessed=(
            B * IN_FEATURES * 4            # x read
            + IN_FEATURES * PAD_N * 4      # resident W read
            + PAD_N * 4                    # resident bias read
            + 2 * B * OUT_PAD * 4          # narrow logits + probs writes
        ),
    )

    logits_pad, probs_pad = pl.pallas_call(
        emo_classifier_kernel,
        out_shape=(
            jax.ShapeDtypeStruct((B, OUT_PAD), jnp.float32),
            jax.ShapeDtypeStruct((B, OUT_PAD), jnp.float32),
        ),
        grid=grid,
        in_specs=[
            pl.BlockSpec((TB, IN_FEATURES), lambda i: (i, 0)),     # x tile (pipelined)
            pl.BlockSpec((IN_FEATURES, PAD_N), lambda i: (0, 0)),  # resident W
            pl.BlockSpec((1, PAD_N), lambda i: (0, 0)),            # resident bias
        ],
        out_specs=(
            pl.BlockSpec((TB, OUT_PAD), lambda i: (i, 0)),
            pl.BlockSpec((TB, OUT_PAD), lambda i: (i, 0)),
        ),
        compiler_params=pltpu.CompilerParams(
            dimension_semantics=("parallel",),
        ),
        cost_estimate=cost,
    )(x, w_pad, b_pad)

    return logits_pad[:, :NUM_CLASSES], probs_pad[:, :NUM_CLASSES]


def init_params(key):
    """nn.Linear default init: U(-1/sqrt(768), 1/sqrt(768)); weight kept as (768, 6)."""
    kw, kb = jax.random.split(key)
    bound = 1.0 / jnp.sqrt(jnp.float32(IN_FEATURES))
    w = jax.random.uniform(
        kw, (IN_FEATURES, NUM_CLASSES), jnp.float32, minval=-bound, maxval=bound
    )
    b = jax.random.uniform(
        kb, (NUM_CLASSES,), jnp.float32, minval=-bound, maxval=bound
    )
    return w, b


if __name__ == "__main__":
    key = jax.random.PRNGKey(0)
    kx, kp = jax.random.split(key)

    B = 16  # small batch; gives a 2-step grid (exercises the pipeline / dual-TC path)
    x = jax.random.normal(kx, (B, IN_FEATURES), jnp.float32)
    w, b = init_params(kp)
    w_pad, b_pad = prepare_params(w, b)   # pad once, outside the per-call path

    logits, probs = emo_classifier(x, w_pad, b_pad)
    jax.block_until_ready((logits, probs))

    # Reference check in plain JAX.
    ref_logits = x @ w + b
    ref_probs = jax.nn.softmax(ref_logits, axis=1)
    assert logits.shape == (B, NUM_CLASSES) and probs.shape == (B, NUM_CLASSES)
    assert jnp.allclose(logits, ref_logits, atol=1e-4, rtol=1e-4)
    assert jnp.allclose(probs, ref_probs, atol=1e-5, rtol=1e-4)
    assert jnp.allclose(jnp.sum(probs, axis=1), 1.0, atol=1e-5)

    print("KERNEL_OK")
</pallas_src>

<mosaic_0001>
module attributes {stable_mosaic.version = 11 : i64} {
  func.func @emo_classifier_kernel(%arg0: i32, %arg1: memref<8x768xf32, #tpu.memory_space<vmem>>, %arg2: memref<768x128xf32, #tpu.memory_space<vmem>>, %arg3: memref<1x128xf32, #tpu.memory_space<vmem>>, %arg4: memref<8x8xf32, #tpu.memory_space<vmem>>, %arg5: memref<8x8xf32, #tpu.memory_space<vmem>>) attributes {dimension_semantics = [#tpu.dimension_semantics<parallel>], iteration_bounds = array<i64: 2>, scalar_prefetch = 0 : i64, scratch_operands = 0 : i64, tpu.core_type = #tpu.core_type<tc>, window_params = [{transform_indices = @transform_0, window_bounds = array<i64: 8, 768>}, {pipeline_mode = #tpu.pipeline_mode<synchronous>, transform_indices = @transform_1, window_bounds = array<i64: 768, 128>}, {pipeline_mode = #tpu.pipeline_mode<synchronous>, transform_indices = @transform_2, window_bounds = array<i64: 1, 128>}, {transform_indices = @transform_3, window_bounds = array<i64: 8, 8>}, {transform_indices = @transform_4, window_bounds = array<i64: 8, 8>}]} {
    %c0 = arith.constant 0 : index
    %c0_0 = arith.constant 0 : index
    %0 = vector.load %arg1[%c0, %c0_0] : memref<8x768xf32, #tpu.memory_space<vmem>>, vector<8x768xf32>
    %c0_1 = arith.constant 0 : index
    %c0_2 = arith.constant 0 : index
    %1 = vector.load %arg2[%c0_1, %c0_2] : memref<768x128xf32, #tpu.memory_space<vmem>>, vector<768x128xf32>
    %cst = arith.constant dense<0.000000e+00> : vector<8x128xf32>
    %2 = tpu.matmul %0, %1, %cst {dimension_numbers = #tpu.dot_dimension_numbers<[1], [0], [0], [1], [0, 0, 1, 1], [], []>} : vector<8x768xf32>, vector<768x128xf32>, vector<8x128xf32> -> vector<8x128xf32>
    %c0_3 = arith.constant 0 : index
    %c0_4 = arith.constant 0 : index
    %3 = vector.load %arg3[%c0_3, %c0_4] : memref<1x128xf32, #tpu.memory_space<vmem>>, vector<1x128xf32>
    %4 = vector.broadcast %3 : vector<1x128xf32> to vector<8x128xf32>
    %5 = arith.addf %2, %4 : vector<8x128xf32>
    %6 = vector.extract_strided_slice %5 {offsets = [0, 0], sizes = [8, 8], strides = [1, 1]} : vector<8x128xf32> to vector<8x8xf32>
    %c0_5 = arith.constant 0 : index
    %c0_6 = arith.constant 0 : index
    %7 = vector.load %arg4[%c0_5, %c0_6] : memref<8x8xf32, #tpu.memory_space<vmem>>, vector<8x8xf32>
    tpu.vector_store %arg4[%c0_5, %c0_6], %6 {strides = array<i32>} : memref<8x8xf32, #tpu.memory_space<vmem>>, vector<8x8xf32>,
    %cst_7 = arith.constant dense<0xFF800000> : vector<8xf32>
    %8 = vector.multi_reduction <maximumf>, %5, %cst_7 [1] : vector<8x128xf32> to vector<8xf32>
    %9 = vector.shape_cast %8 : vector<8xf32> to vector<8x1xf32>
    %10 = vector.broadcast %9 : vector<8x1xf32> to vector<8x128xf32>
    %11 = arith.subf %5, %10 : vector<8x128xf32>
    %12 = math.exp %11 : vector<8x128xf32>
    %cst_8 = arith.constant dense<0.000000e+00> : vector<8xf32>
    %13 = vector.multi_reduction <add>, %12, %cst_8 [1] : vector<8x128xf32> to vector<8xf32>
    %14 = vector.shape_cast %13 : vector<8xf32> to vector<8x1xf32>
    %15 = vector.broadcast %14 : vector<8x1xf32> to vector<8x128xf32>
    %16 = arith.divf %12, %15 : vector<8x128xf32>
    %17 = vector.extract_strided_slice %16 {offsets = [0, 0], sizes = [8, 8], strides = [1, 1]} : vector<8x128xf32> to vector<8x8xf32>
    %c0_9 = arith.constant 0 : index
    %c0_10 = arith.constant 0 : index
    %18 = vector.load %arg5[%c0_9, %c0_10] : memref<8x8xf32, #tpu.memory_space<vmem>>, vector<8x8xf32>
    tpu.vector_store %arg5[%c0_9, %c0_10], %17 {strides = array<i32>} : memref<8x8xf32, #tpu.memory_space<vmem>>, vector<8x8xf32>,
    return
  }
  func.func @transform_0(%arg0: i32) -> (i32, i32) {
    %c0_i32 = arith.constant 0 : i32
    %c0_i32_0 = arith.constant 0 : i32
    return %arg0, %c0_i32 : i32, i32
  }
  func.func @transform_1(%arg0: i32) -> (i32, i32) {
    %c0_i32 = arith.constant 0 : i32
    %c0_i32_0 = arith.constant 0 : i32
    %c0_i32_1 = arith.constant 0 : i32
    return %c0_i32, %c0_i32_0 : i32, i32
  }
  func.func @transform_2(%arg0: i32) -> (i32, i32) {
    %c0_i32 = arith.constant 0 : i32
    %c0_i32_0 = arith.constant 0 : i32
    %c0_i32_1 = arith.constant 0 : i32
    return %c0_i32, %c0_i32_0 : i32, i32
  }
  func.func @transform_3(%arg0: i32) -> (i32, i32) {
    %c0_i32 = arith.constant 0 : i32
    %c0_i32_0 = arith.constant 0 : i32
    return %arg0, %c0_i32 : i32, i32
  }
  func.func @transform_4(%arg0: i32) -> (i32, i32) {
    %c0_i32 = arith.constant 0 : i32
    %c0_i32_0 = arith.constant 0 : i32
    return %arg0, %c0_i32 : i32, i32
  }
}

</mosaic_0001>

<bundles_post_ra>
// kernel: tpu_custom_call.1
= control target key start
LH: loop header
LB: loop body
LE: loop exit
PB: predicated region body
PF: predicated region fallthrough
CT: control target
= control target key end

     0   :  { %10 = vsyncpa [#allocation3], 0  ;;  %s1229_s0 = inlined_call_operand.hbm [shape: f32[16,768], index: 0, kind: input, shape index: {}]   ;;  %s1230_s1 = inlined_call_operand.hbm [shape: f32[768,128], index: 1, kind: input, shape index: {}]   ;;  %s1231_s2 = inlined_call_operand.vmem [shape: f32[1,128], index: 2, kind: input, shape index: {}]   ;;  %s1232_s3 = inlined_call_operand.vmem [shape: f32[16,8], index: 3, kind: output, shape index: {0}]   ;;  %s1233_s4 = inlined_call_operand.vmem [shape: f32[16,8], index: 4, kind: output, shape index: {1}]  }
   0x1   :  { %12 = vsyncpa [#allocation3 + $0x1], 0 }
   0x2   :  { %13 = vsyncpa [#allocation5], 0  ;;  %s1076_s15 = smov 0   ;;  %s1078_s16 = smov 0  }
   0x3   :  { %s1080_s17 = smov 0   ;;  %s1082_s18 = smov 0  }
   0x4 LB: > { %s1095_s19 = sadd.s32 4294967295, %s1045_s18   ;;  %p39_p0 = scmp.ne.s32.totalorder %s1037_s16, %s1033_s15  ;;  %s1045_s18 = sphi %s1082_s18, %s1248_s18   ;;  %s1041_s17 = sphi %s1080_s17, %s1247_s17   ;;  %s1037_s16 = sphi %s1078_s16, %s1246_s16   ;;  %s1033_s15 = sphi %s1076_s15, %s1245_s15  }
   0x5   : > { %p1234_p1 = scmp.eq.s32.totalorder %s1095_s19, 0  ;;  %p678_p2 = scmp.ge.s32.totalorder %s1045_s18, 1 }
   0x6   : > { %p144_p3 = scmp.lt.s32.totalorder %s1045_s18, 3  ;;  %s1047_s22 = smov [#allocation4]  }
   0x7   : > { %p1103_p4 = por %p1234_p1, %p39_p0  ;;  %s156_s23 = sshll.u32 %s1047_s22, 4  ;;  %s157_s23 = int_to_ptr.vmem [resolvable:$true] %s156_s23 }
   0x8   : > { %p1107_p5 = pnand %p678_p2, %p144_p3  ;;  %s1120_s25 = sadd.s32 1, %s1045_s18  }
   0x9   : > { %s1237_s20 = scalar_select %p1103_p4, 1, 0 }
   0xa   : > { %s1238_s21 = scalar_select %p1107_p5, 1, 0 }
   0xb   : > { %p899_p6 = pneg %p1107_p5  ;;  %s26_s26 = sadd.s32 1, %s1041_s17 }
   0xc   : > { %s23_s27 = ssub.s32 %s1045_s18, %s1120_s25  ;;  %s949_s30 = scalar_lea.hbm %s1230_s1, 12288 }
   0xd   : > { %p1115_p7 = pnand %p899_p6, %p1234_p1  ;;  %p950_p8 = scmp.ne.s32.totalorder %s1230_s1, %s949_s30 }
   0xe   : > { %p956_p12 = scmp.lt.u32.totalorder %s949_s30, %s1230_s1 }
   0xf   : > { %p951_p9 = pneg %p1115_p7 }
  0x11   : > { %p952_p10 = pnand %p951_p9, %p950_p8 }
  0x13   : > { %p953_p11 = pneg %p952_p10 }
  0x15   : > { %p958_p13 = pnand %p956_p12, %p953_p11 }
  0x17   : > { %961 = shalt.err (!%p958_p13)
}
  0x18   : > { %s962_s9 = scalar_lea.vmem %s157_s23, 12288  ;;  %p970_p6 = scmp.lt.s32.totalorder %s157_s23, %s157_s23 }
  0x19   : > { %p963_p0 = scmp.ne.s32.totalorder %s157_s23, %s962_s9  ;;  %p971_p1 = scmp.lt.s32.totalorder %s962_s9, %s962_s9 }
  0x1b   : > { %p965_p2 = pnand %p963_p0, %p951_p9  ;;  %p972_p4 = por %p971_p1, %p970_p6 }
  0x1d   : > { %p966_p3 = pneg %p965_p2 }
  0x1f   : > { %p973_p5 = pnand %p972_p4, %p966_p3 }
  0x21   : > { %976 = shalt.err (!%p973_p5)
}
  0x22   : > { %s1048_s10 = smov 128   ;;  %s1049_s11 = smov 8  }
  0x23   : > { %902 = dma.hbm_to_vmem [thread:$0]  (!%p1115_p7), %s1230_s1, 12288, %s157_s23, [#allocation5], %s1048_s10, %s1048_s10, %s1049_s11  }
  0x24   : > { %p24_p8 = scmp.eq.s32.totalorder %s23_s27, 0  ;;  %p33_p9 = scmp.ne.s32.totalorder %s1041_s17, %s1037_s16 }
  0x25   : > { %p34_p1 = scmp.eq.s32.totalorder %s1045_s18, 0  ;;  %p908_p4 = scmp.lt.s32.totalorder %s1045_s18, 2 }
  0x26   : > { %s1146_s14 = scalar_select %p24_p8, %s1041_s17, %s26_s26  }
  0x27   : > { %p35_p5 = por %p34_p1, %p33_p9  ;;  %s173_s15 = sand.u32 1, %s1041_s17  }
  0x28   : > { %s890_s22 = smul.u32 48, %s173_s15  ;;  %s982_s8 = scalar_lea.hbm %s1229_s0, 1536 }
  0x29   : > { %s891_s28 = smul.u32 768, %s1045_s18  ;;  %p1150_p10 = pnand %p908_p4, %p35_p5 }
  0x2a   : > { %s177_s26 = scalar_lea.vmem [#allocation2], %s890_s22  ;;  %s174_s18 = scalar_lea.sflag [#allocation3], %s173_s15 }
  0x2b   : > { %s1157_s23 = scalar_lea.hbm %s1229_s0, %s891_s28  ;;  %s185_s27 = sshll.u32 %s177_s26, 4  ;;  %s1159_s27 = int_to_ptr.vmem [resolvable:$true] %s185_s27 }
  0x2c   : > { %s977_s5 = scalar_lea.hbm %s1157_s23, 768  ;;  %p979_p11 = pneg %p1150_p10 }
  0x2d   : > { %p978_p7 = scmp.ne.s32.totalorder %s1157_s23, %s977_s5  ;;  %p983_p0 = scmp.lt.u32.totalorder %s1157_s23, %s1229_s0 }
  0x2e   : > { %p984_p2 = scmp.lt.u32.totalorder %s982_s8, %s977_s5  ;;  %p986_p6 = scmp.lt.u32.totalorder %s977_s5, %s1157_s23 }
  0x2f   : > { %p980_p12 = pnand %p979_p11, %p978_p7 }
  0x30   : > { %p985_p3 = por %p984_p2, %p983_p0 }
  0x31   : > { %p981_p13 = pneg %p980_p12 }
  0x32   : > { %p987_p8 = por %p986_p6, %p985_p3 }
  0x34   : > { %p988_p9 = pnand %p987_p8, %p981_p13 }
  0x36   : > { %991 = shalt.err (!%p988_p9)
}
  0x37   : > { %s992_s11 = scalar_lea.vmem %s1159_s27, 768  ;;  %s1050_s12 = smov [#allocation2]  }
  0x38   : > { %p993_p1 = scmp.ne.s32.totalorder %s1159_s27, %s992_s11  ;;  %s997_s13 = sshll.u32 %s1050_s12, 4  ;;  %s998_s13 = int_to_ptr.vmem [resolvable:$false] %s997_s13 }
  0x39   : > { %s999_s15 = scalar_lea.vmem %s998_s13, 1536  ;;  %p1000_p7 = scmp.lt.s32.totalorder %s1159_s27, %s998_s13 }
  0x3a   : > { %p995_p4 = pnand %p993_p1, %p979_p11  ;;  %p1001_p12 = scmp.lt.s32.totalorder %s999_s15, %s992_s11 }
  0x3c   : > { %p996_p5 = pneg %p995_p4  ;;  %p1002_p0 = por %p1001_p12, %p1000_p7 }
  0x3e   : > { %p1003_p2 = pnand %p1002_p0, %p996_p5 }
  0x40   : > { %1006 = shalt.err (!%p1003_p2)
}
  0x41   : > { %906 = dma.hbm_to_vmem [thread:$0]  (!%p1150_p10), %s1157_s23, 768, %s1159_s27, %s174_s18  }
  0x42   : > { %p1241_p13 = scmp.ne.s32.totalorder %s1238_s21, 0 }
  0x43   : > { %s196_s22 = sand.u32 (!%p1241_p13), 1, %s1037_s16   ;;  %p1242_p11 = scmp.ne.s32.totalorder (!%p1241_p13), %s1237_s20, 0 }
  0x44   : > { %194 = sbr.rel (%p1241_p13) target bundleno = 676 (0x2a4), region = 32  ;;  %s197_s30 = scalar_lea.sflag (!%p1241_p13), [#allocation3], %s196_s22 }
  0x45   : > { %s892_s28 = smul.u32 (!%p1241_p13), 48, %s196_s22 }
  0x47   : > { %s1189_s24 = scalar_lea.vmem (!%p1241_p13), [#allocation2], %s892_s28 }
  0x4b   : > { %1024 = dma.done.wait (%p1242_p11), %s197_s30, 768  }
  0x4c   : > { %1026 = vsyncadd (%p1242_p11), %s197_s30, 4294966528  ;;  %p1243_p3 = scmp.eq.s32.totalorder %s1095_s19, 0 }
  0x4e   : > { %1028 = dma.done.wait (%p1243_p3), [#allocation5], 12288   ;;  %p1244_p10 = pmov %p1243_p3 }
  0x4f   : > { %v262_v0 = vld [vmem:[#allocation4 + $0x80] sm:$0xff]  ;;  %v263_v1 = vld [vmem:[#allocation4 + $0x88] sm:$0xff]  ;;  %v264_v11 = vld [vmem:[#allocation4 + $0x90] sm:$0xff]  ;;  %p232_p6 = scmp.lt.s32.totalorder %s1095_s19, 1  ;;  %vm559_vm0 = vcmask 64512  }
  0x50   : > { %1030 = vsyncadd (%p1244_p10), [#allocation5], 4294955008  ;;  %v246_v2 = vld [vmem:[#allocation4] sm:$0xff]  ;;  %v794_v3 = vpack.c.bf16 %v263_v1, %v262_v0  ;;  %v247_v4 = vld [vmem:[#allocation4 + $0x8] sm:$0xff] }
  0x51   : > { %v294_v5 = vld [vmem:[#allocation4 + $0x180] sm:$0xff]  ;;  %v295_v6 = vld [vmem:[#allocation4 + $0x188] sm:$0xff]  ;;  %v796_v7 = vpack.c.bf16 %v247_v4, %v246_v2  ;;  %v265_v13 = vld [vmem:[#allocation4 + $0x98] sm:$0xff]  ;;  %s1250_s19 = smov (!%p232_p6, %s1095_s19), 1 }
  0x52   : > { %v826_v8 = vpack.c.bf16 %v295_v6, %v294_v5  ;;  %v278_v9 = vld [vmem:[#allocation4 + $0x100] sm:$0xff]  ;;  %v279_v10 = vld [vmem:[#allocation4 + $0x108] sm:$0xff]  ;;  %795 = vmatprep.subr.bf16.mxu0 %v794_v3  ;;  %v248_v14 = vld [vmem:[#allocation4 + $0x10] sm:$0xff]  ;;  %v798_v16 = vpack.c.bf16 %v265_v13, %v264_v11  ;;  %s684_s29 = sshll.u32 %s1250_s19, 3 }
  0x53   : > { %v828_v12 = vpack.c.bf16 %v279_v10, %v278_v9  ;;  %v249_v15 = vld [vmem:[#allocation4 + $0x18] sm:$0xff]  ;;  %797 = vmatpush3.bf16.msra.mxu0 %v796_v7  ;;  %v296_v18 = vld [vmem:[#allocation4 + $0x190] sm:$0xff]  ;;  %v266_v23 = vld [vmem:[#allocation4 + $0xa0] sm:$0xff]  ;;  %s235_s27 = scalar_lea.vmem %s1232_s3, %s684_s29  ;;  %s239_s5 = scalar_lea.vmem %s1233_s4, %s684_s29 }
  0x54   : > { %827 = vmatprep.subr.bf16.mxu1 %v826_v8  ;;  %v800_v17 = vpack.c.bf16 %v249_v15, %v248_v14  ;;  %v297_v19 = vld [vmem:[#allocation4 + $0x198] sm:$0xff]  ;;  %v280_v20 = vld [vmem:[#allocation4 + $0x110] sm:$0xff]  ;;  %v267_v24 = vld [vmem:[#allocation4 + $0xa8] sm:$0xff]  ;;  %799 = vmatprep.subr.bf16.mxu0 %v798_v16 }
  0x55   : > { %829 = vmatpush3.bf16.msra.mxu1 %v828_v12  ;;  %v830_v21 = vpack.c.bf16 %v297_v19, %v296_v18  ;;  %v281_v22 = vld [vmem:[#allocation4 + $0x118] sm:$0xff]  ;;  %v802_v26 = vpack.c.bf16 %v267_v24, %v266_v23  ;;  %v250_v27 = vld [vmem:[#allocation4 + $0x20] sm:$0xff]  ;;  %v251_v28 = vld [vmem:[#allocation4 + $0x28] sm:$0xff] }
  0x56   : > { %v832_v25 = vpack.c.bf16 %v281_v22, %v280_v20  ;;  %v298_v29 = vld [vmem:[#allocation4 + $0x1a0] sm:$0xff]  ;;  %v299_v30 = vld [vmem:[#allocation4 + $0x1a8] sm:$0xff]  ;;  %v804_v33 = vpack.c.bf16 %v251_v28, %v250_v27  ;;  %v268_v35 = vld [vmem:[#allocation4 + $0xb0] sm:$0xff] }
  0x57   : > { %831 = vmatprep.subr.bf16.mxu1 %v830_v21  ;;  %v282_v31 = vld [vmem:[#allocation4 + $0x120] sm:$0xff]  ;;  %v283_v32 = vld [vmem:[#allocation4 + $0x128] sm:$0xff]  ;;  %801 = vmatpush3.bf16.msra.mxu0 %v800_v17  ;;  %v834_v34 = vpack.c.bf16 %v299_v30, %v298_v29  ;;  %v269_v36 = vld [vmem:[#allocation4 + $0xb8] sm:$0xff] }
  0x58   : > { %v252_v37 = vld [vmem:[#allocation4 + $0x30] sm:$0xff]  ;;  %803 = vmatprep.subr.bf16.mxu0 %v802_v26  ;;  %v836_v38 = vpack.c.bf16 %v283_v32, %v282_v31  ;;  %v806_v39 = vpack.c.bf16 %v269_v36, %v268_v35  ;;  %v253_v40 = vld [vmem:[#allocation4 + $0x38] sm:$0xff]  ;;  %v270_v46 = vld [vmem:[#allocation4 + $0xc0] sm:$0xff] }
  0x59   : > { %833 = vmatpush3.bf16.msra.mxu1 %v832_v25  ;;  %v300_v41 = vld [vmem:[#allocation4 + $0x1b0] sm:$0xff]  ;;  %v301_v42 = vld [vmem:[#allocation4 + $0x1b8] sm:$0xff]  ;;  %v271_v47 = vld [vmem:[#allocation4 + $0xc8] sm:$0xff]  ;;  %v808_v48 = vpack.c.bf16 %v253_v40, %v252_v37 }
  0x5a   : > { %835 = vmatprep.subr.bf16.mxu1 %v834_v34  ;;  %v838_v43 = vpack.c.bf16 %v301_v42, %v300_v41  ;;  %v284_v44 = vld [vmem:[#allocation4 + $0x130] sm:$0xff]  ;;  %v285_v45 = vld [vmem:[#allocation4 + $0x138] sm:$0xff]  ;;  %v302_v49 = vld [vmem:[#allocation4 + $0x1c0] sm:$0xff]  ;;  %v810_v52 = vpack.c.bf16 %v271_v47, %v270_v46 }
  0x5b   : > { %805 = vmatpush3.bf16.msra.mxu0 %v804_v33  ;;  %v303_v50 = vld [vmem:[#allocation4 + $0x1c8] sm:$0xff]  ;;  %v840_v51 = vpack.c.bf16 %v285_v45, %v284_v44  ;;  %v254_v53 = vld [vmem:[#allocation4 + $0x40] sm:$0xff]  ;;  %v272_v58 = vld [vmem:[#allocation4 + $0xd0] sm:$0xff] }
  0x5c   : > { %807 = vmatprep.subr.bf16.mxu0 %v806_v39  ;;  %v255_v54 = vld [vmem:[#allocation4 + $0x48] sm:$0xff]  ;;  %v286_v55 = vld [vmem:[#allocation4 + $0x140] sm:$0xff]  ;;  %v842_v56 = vpack.c.bf16 %v303_v50, %v302_v49  ;;  %v273_v59 = vld [vmem:[#allocation4 + $0xd8] sm:$0xff] }
  0x5d   : > { %837 = vmatpush3.bf16.msra.mxu1 %v836_v38  ;;  %v287_v57 = vld [vmem:[#allocation4 + $0x148] sm:$0xff]  ;;  %v304_v60 = vld [vmem:[#allocation4 + $0x1d0] sm:$0xff]  ;;  %v305_v61 = vld [vmem:[#allocation4 + $0x1d8] sm:$0xff]  ;;  %v812_v62 = vpack.c.bf16 %v255_v54, %v254_v53  ;;  %v814_v0 = vpack.c.bf16 %v273_v59, %v272_v58 }
  0x5e   : > { %839 = vmatprep.subr.bf16.mxu1 %v838_v43  ;;  %v844_v63 = vpack.c.bf16 %v287_v57, %v286_v55  ;;  %v256_v1 = vld [vmem:[#allocation4 + $0x50] sm:$0xff]  ;;  %v257_v2 = vld [vmem:[#allocation4 + $0x58] sm:$0xff]  ;;  %v846_v4 = vpack.c.bf16 %v305_v61, %v304_v60  ;;  %v274_v6 = vld [vmem:[#allocation4 + $0xe0] sm:$0xff] }
  0x5f   : > { %809 = vmatpush3.bf16.msra.mxu0 %v808_v48  ;;  %v288_v3 = vld [vmem:[#allocation4 + $0x150] sm:$0xff]  ;;  %v289_v5 = vld [vmem:[#allocation4 + $0x158] sm:$0xff]  ;;  %v275_v7 = vld [vmem:[#allocation4 + $0xe8] sm:$0xff]  ;;  %v816_v10 = vpack.c.bf16 %v257_v2, %v256_v1 }
  0x60   : > { %811 = vmatprep.subr.bf16.mxu0 %v810_v52  ;;  %v306_v8 = vld [vmem:[#allocation4 + $0x1e0] sm:$0xff]  ;;  %v307_v9 = vld [vmem:[#allocation4 + $0x1e8] sm:$0xff]  ;;  %v848_v13 = vpack.c.bf16 %v289_v5, %v288_v3  ;;  %v818_v14 = vpack.c.bf16 %v275_v7, %v274_v6  ;;  %v276_v19 = vld [vmem:[#allocation4 + $0xf0] sm:$0xff] }
  0x61   : > { %841 = vmatpush3.bf16.msra.mxu1 %v840_v51  ;;  %v258_v11 = vld [vmem:[#allocation4 + $0x60] sm:$0xff]  ;;  %v241_v12 = vld [vmem:[%s1189_s24 + $0x8] sm:$0xff]  ;;  %v850_v18 = vpack.c.bf16 %v307_v9, %v306_v8  ;;  %v243_v21 = vld [vmem:[%s1189_s24 + $0x18] sm:$0xff] }
  0x62   : > { %843 = vmatprep.subr.bf16.mxu1 %v842_v56  ;;  %v259_v15 = vld [vmem:[#allocation4 + $0x68] sm:$0xff]  ;;  %v290_v16 = vld [vmem:[#allocation4 + $0x160] sm:$0xff]  ;;  %v277_v20 = vld [vmem:[#allocation4 + $0xf8] sm:$0xff]  ;;  %413 = vmatprep.mubr.f32.mxu0 %v241_v12 }
  0x63   : > { %813 = vmatpush3.bf16.msra.mxu0 %v812_v62  ;;  %v291_v17 = vld [vmem:[#allocation4 + $0x168] sm:$0xff]  ;;  %v308_v22 = vld [vmem:[#allocation4 + $0x1f0] sm:$0xff]  ;;  %v309_v23 = vld [vmem:[#allocation4 + $0x1f8] sm:$0xff]  ;;  %483 = vmatprep.mubr.f32.mxu1 %v243_v21  ;;  %v820_v24 = vpack.c.bf16 %v259_v15, %v258_v11  ;;  %v822_v26 = vpack.c.bf16 %v277_v20, %v276_v19 }
  0x64   : > { %815 = vmatprep.subr.bf16.mxu0 %v814_v0  ;;  %v852_v25 = vpack.c.bf16 %v291_v17, %v290_v16  ;;  %v260_v27 = vld [vmem:[#allocation4 + $0x70] sm:$0xff]  ;;  %v261_v28 = vld [vmem:[#allocation4 + $0x78] sm:$0xff]  ;;  %v854_v30 = vpack.c.bf16 %v309_v23, %v308_v22  ;;  %v326_v32 = vld [vmem:[#allocation4 + $0x280] sm:$0xff] }
  0x65   : > { %845 = vmatpush3.bf16.msra.mxu1 %v844_v63  ;;  %v292_v29 = vld [vmem:[#allocation4 + $0x170] sm:$0xff]  ;;  %v293_v31 = vld [vmem:[#allocation4 + $0x178] sm:$0xff]  ;;  %v327_v33 = vld [vmem:[#allocation4 + $0x288] sm:$0xff]  ;;  %v824_v34 = vpack.c.bf16 %v261_v28, %v260_v27 }
  0x66   : > { %847 = vmatprep.subr.bf16.mxu1 %v846_v4  ;;  %v856_v35 = vpack.c.bf16 %v293_v31, %v292_v29  ;;  %v858_v36 = vpack.c.bf16 %v327_v33, %v326_v32  ;;  %v310_v37 = vld [vmem:[#allocation4 + $0x200] sm:$0xff]  ;;  %v311_v38 = vld [vmem:[#allocation4 + $0x208] sm:$0xff]  ;;  %v328_v39 = vld [vmem:[#allocation4 + $0x290] sm:$0xff] }
  0x67   : > { %817 = vmatpush3.bf16.msra.mxu0 %v816_v10  ;;  %v329_v40 = vld [vmem:[#allocation4 + $0x298] sm:$0xff]  ;;  %v240_v41 = vld [vmem:[%s1189_s24] sm:$0xff]  ;;  %v860_v42 = vpack.c.bf16 %v311_v38, %v310_v37  ;;  %v242_v43 = vld [vmem:[%s1189_s24 + $0x10] sm:$0xff] }
  0x68   : > { %819 = vmatprep.subr.bf16.mxu0 %v818_v14  ;;  %v862_v44 = vpack.c.bf16 %v329_v40, %v328_v39  ;;  %v312_v45 = vld [vmem:[#allocation4 + $0x210] sm:$0xff]  ;;  %v313_v46 = vld [vmem:[#allocation4 + $0x218] sm:$0xff]  ;;  %v330_v47 = vld [vmem:[#allocation4 + $0x2a0] sm:$0xff] }
  0x69   : > { %849 = vmatpush3.bf16.msra.mxu1 %v848_v13  ;;  %v331_v48 = vld [vmem:[#allocation4 + $0x2a8] sm:$0xff]  ;;  %v864_v50 = vpack.c.bf16 %v313_v46, %v312_v45  ;;  %v314_v52 = vld [vmem:[#allocation4 + $0x220] sm:$0xff]  ;;  %v332_v54 = vld [vmem:[#allocation4 + $0x2b0] sm:$0xff] }
  0x6a   : > { %851 = vmatprep.subr.bf16.mxu1 %v850_v18  ;;  %v245_v49 = vld [vmem:[%s1189_s24 + $0x28] sm:$0xff]  ;;  %v866_v51 = vpack.c.bf16 %v331_v48, %v330_v47  ;;  %v316_v58 = vld [vmem:[#allocation4 + $0x230] sm:$0xff]  ;;  %v334_v60 = vld [vmem:[#allocation4 + $0x2c0] sm:$0xff] }
  0x6b   : > { %821 = vmatpush3.bf16.msra.mxu0 %v820_v24  ;;  %v315_v53 = vld [vmem:[#allocation4 + $0x228] sm:$0xff]  ;;  %v333_v55 = vld [vmem:[#allocation4 + $0x2b8] sm:$0xff]  ;;  %v318_v0 = vld [vmem:[#allocation4 + $0x240] sm:$0xff] }
  0x6c   : > { %823 = vmatprep.subr.bf16.mxu0 %v822_v26  ;;  %v868_v56 = vpack.c.bf16 %v315_v53, %v314_v52  ;;  %v870_v57 = vpack.c.bf16 %v333_v55, %v332_v54  ;;  %v317_v59 = vld [vmem:[#allocation4 + $0x238] sm:$0xff]  ;;  %v335_v61 = vld [vmem:[#allocation4 + $0x2c8] sm:$0xff]  ;;  %v336_v2 = vld [vmem:[#allocation4 + $0x2d0] sm:$0xff] }
  0x6d   : > { %853 = vmatpush3.bf16.msra.mxu1 %v852_v25  ;;  %v872_v62 = vpack.c.bf16 %v317_v59, %v316_v58  ;;  %v874_v63 = vpack.c.bf16 %v335_v61, %v334_v60  ;;  %v319_v1 = vld [vmem:[#allocation4 + $0x248] sm:$0xff]  ;;  %v337_v3 = vld [vmem:[#allocation4 + $0x2d8] sm:$0xff]  ;;  %v320_v6 = vld [vmem:[#allocation4 + $0x250] sm:$0xff] }
  0x6e   : > { %855 = vmatprep.subr.bf16.mxu1 %v854_v30  ;;  %v876_v4 = vpack.c.bf16 %v319_v1, %v318_v0  ;;  %v878_v5 = vpack.c.bf16 %v337_v3, %v336_v2  ;;  %v321_v7 = vld [vmem:[#allocation4 + $0x258] sm:$0xff]  ;;  %v338_v8 = vld [vmem:[#allocation4 + $0x2e0] sm:$0xff]  ;;  %v339_v9 = vld [vmem:[#allocation4 + $0x2e8] sm:$0xff] }
  0x6f   : > { %825 = vmatpush3.bf16.msra.mxu0 %v824_v34  ;;  %v880_v10 = vpack.c.bf16 %v321_v7, %v320_v6  ;;  %v882_v11 = vpack.c.bf16 %v339_v9, %v338_v8  ;;  %v322_v12 = vld [vmem:[#allocation4 + $0x260] sm:$0xff]  ;;  %v323_v13 = vld [vmem:[#allocation4 + $0x268] sm:$0xff]  ;;  %v340_v14 = vld [vmem:[#allocation4 + $0x2f0] sm:$0xff] }
  0x70   : > { %859 = vmatprep.subr.bf16.mxu0 %v858_v36  ;;  %v341_v15 = vld [vmem:[#allocation4 + $0x2f8] sm:$0xff]  ;;  %v884_v16 = vpack.c.bf16 %v323_v13, %v322_v12  ;;  %v324_v18 = vld [vmem:[#allocation4 + $0x270] sm:$0xff]  ;;  %v686_v23 = vld [vmem:[%s1231_s2] ss:$0 sm:$0xff] }
  0x71   : > { %857 = vmatpush3.bf16.msra.mxu1 %v856_v35  ;;  %v886_v17 = vpack.c.bf16 %v341_v15, %v340_v14  ;;  %v325_v19 = vld [vmem:[#allocation4 + $0x278] sm:$0xff]  ;;  %v244_v21 = vld [vmem:[%s1189_s24 + $0x20] sm:$0xff] }
  0x72   : > { %414 = vmatmul.mubr.f32.vlgmr.msra.gmra.mrb[0].mxu0 %v240_v41  ;;  %v888_v20 = vpack.c.bf16 %v325_v19, %v324_v18 }
  0x73   : > { %861 = vmatpush3.bf16.msra.mxu0 %v860_v42  ;;  %553 = vmatprep.mubr.f32.mxu0 %v245_v49 }
  0x74   : > { %484 = vmatmul.mubr.f32.vlgmr.msra.gmra.mrb[0].mxu1 %v242_v43  ;;  %863 = vmatprep.subr.bf16.mxu0 %v862_v44 }
  0x77   : > { %865 = vmatpush3.bf16.msra.mxu0 %v864_v50 }
  0x78   : > { %867 = vmatprep.subr.bf16.mxu0 %v866_v51 }
  0x7b   : > { %869 = vmatpush3.bf16.msra.mxu0 %v868_v56 }
  0x7c   : > { %871 = vmatprep.subr.bf16.mxu0 %v870_v57 }
  0x7f   : > { %873 = vmatpush3.bf16.msra.mxu0 %v872_v62 }
  0x80   : > { %875 = vmatprep.subr.bf16.mxu0 %v874_v63 }
  0x83   : > { %877 = vmatpush3.bf16.msra.mxu0 %v876_v4 }
  0x84   : > { %879 = vmatprep.subr.bf16.mxu0 %v878_v5 }
  0x87   : > { %881 = vmatpush3.bf16.msra.mxu0 %v880_v10 }
  0x88   : > { %883 = vmatprep.subr.bf16.mxu0 %v882_v11 }
  0x8b   : > { %885 = vmatpush3.bf16.msra.mxu0 %v884_v16 }
  0x8c   : > { %887 = vmatprep.subr.bf16.mxu0 %v886_v17 }
  0x8f   : > { %889 = vmatpush3.bf16.msra.mxu0 %v888_v20 }
  0x92   : > { %554 = vmatmul.mubr.f32.vlgmr.msra.gmra.mrb[2].mxu0 %v244_v21 }
 0x145   : > { %v721_v22 = vpop.f32.mrb[0].mxu0 }
 0x146   : > { %v722_v24 = vpop.f32.mrb[1].mxu0 }
 0x147   : > { %v756_v25 = vpop.f32.mrb[0].mxu1  ;;  %v723_v26 = vadd.f32 %v722_v24, %v721_v22 }
 0x148   : > { %v757_v27 = vpop.f32.mrb[1].mxu1 }
 0x149   : > { %v758_v28 = vadd.f32 %v757_v27, %v756_v25  ;;  %v416_v29 = vadd.f32 %v723_v26, %v686_v23 }
 0x14b   : > { %v486_v30 = vadd.f32 %v758_v28, %v416_v29 }
 0x165   : > { %v791_v31 = vpop.f32.mrb[2].mxu0 }
 0x166   : > { %v792_v32 = vpop.f32.mrb[3].mxu0 }
 0x167   : > { %v793_v33 = vadd.f32 %v792_v32, %v791_v31 }
 0x169   : > { %v556_v34 = vadd.f32 %v793_v33, %v486_v30 }
 0x16b   : > { %560 = vst.msk [vmem:[%s235_s27] sm:$0xff] %vm559_vm0, %v556_v34  ;;  %561 = vmax.xlane.f32.xlu0 %v556_v34 }
 0x1f8   : > { %v562_v35 = vpop.xlane.xlu0 %561 }
 0x1f9   : > { %v563_v36 = vsub.f32 %v556_v34, %v562_v35 }
 0x1fb   : > { %v564_v37 = vmul.f32 1.442695, %v563_v36 }
 0x1fd   : > { %945 = vpow2.f32 %v564_v37 }
 0x207   : > { %v946_v38 = vpop.eup %945 }
 0x208   : > { %566 = vadd.xlane.f32.xlu0 %v946_v38 }
 0x295   : > { %v567_v39 = vpop.xlane.xlu0 %566 }
 0x296   : > { %947 = vrcp.f32 %v567_v39 }
 0x2a0   : > { %v948_v40 = vpop.eup %947 }
 0x2a1   : > { %v569_v41 = vmul.f32 %v948_v40, %v946_v38 }
 0x2a3   : > { %570 = vst.msk [vmem:[%s239_s5] sm:$0xff] %vm559_vm0, %v569_v41 }
 0x2a4 PF: > { %p16_p8 = scmp.ge.s32.totalorder %s1120_s25, 4   ;;  %s1245_s15 = smov %s1037_s16 }
 0x2a5   : > { %s1246_s16 = smov %s1041_s17  ;;  %s1247_s17 = smov %s1146_s14 }
 0x2a6   : > { %s1248_s18 = smov %s1120_s25  ;;  %18 = sbr.rel (!%p16_p8) target bundleno = 4 (0x4), region = 88 }
 0x2ad   :  { %604 = vsyncpa [#allocation3], 1 }
 0x2ae   :  { %606 = vsyncpa [#allocation3 + $0x1], 1 }
 0x2af   :  { %607 = vsyncpa [#allocation5], 1 }

</bundles_post_ra>
